<compile_context>
chip_gen: v7x
topology: tpu7x:2x2x1
jax: 0.10.0
libtpu: 0.0.40
codegen_flags: <defaults>
</compile_context>

<pallas_src>
import jax
import jax.numpy as jnp
from jax import lax
from jax.experimental import pallas as pl
from jax.experimental.pallas import tpu as pltpu


def policy_mlp_kernel(x_ref, w1_ref, b1_ref, w2_ref, b2_ref, w3_ref, b3_ref,
                      o_ref):
    x = x_ref[...]                                             # (TB, 19)

    # fc1 + ReLU: contract the 19-feature dim of both operands.
    #   (32, 19) . (TB, 19) -> (32, TB)   (lane-dense: batch on the lane axis)
    h1 = lax.dot_general(w1_ref[...], x, (((1,), (1,)), ((), ())),
                         preferred_element_type=jnp.float32)
    h1 = jnp.maximum(h1 + b1_ref[...], 0.0)

    # fc2 + ReLU:  (16, 32) @ (32, TB) -> (16, TB)
    h2 = jnp.dot(w2_ref[...], h1, preferred_element_type=jnp.float32)
    h2 = jnp.maximum(h2 + b2_ref[...], 0.0)

    # fc3:  (3, 16) @ (16, TB) -> (3, TB)
    logits = jnp.dot(w3_ref[...], h2, preferred_element_type=jnp.float32)
    logits = logits + b3_ref[...]

    # Numerically-stable softmax over the 3 class rows (sublane axis).
    # Per-row max/add keeps the reduction on the VPU (no XLU cross-lane
    # reduce).  Exact division for the normalization: EUP/VPU have huge slack
    # here, and it guarantees the rows sum to 1 in f32.
    l0 = logits[0:1, :]
    l1 = logits[1:2, :]
    l2 = logits[2:3, :]
    m = jnp.maximum(jnp.maximum(l0, l1), l2)                   # (1, TB)
    e = jnp.exp(logits - m)                                    # (3, TB)
    denom = e[0:1, :] + e[1:2, :] + e[2:3, :]                  # (1, TB)
    o_ref[...] = e / denom


def policy_network_forward(x, params, *, tb=4096):
    """x: (B, 19) float32; params: PyTorch-layout weights (out,in) / (out,1)."""
    B = x.shape[0]

    # Batch tile (lives on the 128-lane axis of the activations):
    #   * multiple of 128, never grossly larger than the batch itself,
    #   * large by default (4096) so the ~0.35us/step fixed overhead is
    #     amortized against the per-step DMA,
    #   * capped so the grid keeps >= 2 steps for mid/large batches so both
    #     TensorCores get work on v7x (harmless on v5e/v6e).
    tb = max(128, min(tb, pl.cdiv(B, 128) * 128))
    if B > 256 and pl.cdiv(B, tb) < 2:
        tb = max(128, pl.cdiv(pl.cdiv(B, 2), 128) * 128)

    Bp = pl.cdiv(B, tb) * tb
    grid = (Bp // tb,)

    x = x.astype(jnp.float32)
    if Bp != B:
        # Pad only the ragged tail rows (no transpose pre-pass over x).
        x = jnp.pad(x, ((0, Bp - B), (0, 0)))

    w1, b1 = params["w1"], params["b1"]   # (32, 19), (32, 1)
    w2, b2 = params["w2"], params["b2"]   # (16, 32), (16, 1)
    w3, b3 = params["w3"], params["b3"]   # (3, 16),  (3, 1)

    const = lambda i: (0, 0)              # weights stay VMEM-resident
    flops = 2 * Bp * (19 * 32 + 32 * 16 + 16 * 3)
    bytes_accessed = 4 * (Bp * (19 + 3)
                          + 32 * 19 + 32 + 16 * 32 + 16 + 3 * 16 + 3)

    outT = pl.pallas_call(
        policy_mlp_kernel,
        out_shape=jax.ShapeDtypeStruct((3, Bp), jnp.float32),
        grid=grid,
        in_specs=[
            pl.BlockSpec((tb, 19), lambda i: (i, 0)),   # x tile, pipelined
            pl.BlockSpec(w1.shape, const),
            pl.BlockSpec(b1.shape, const),
            pl.BlockSpec(w2.shape, const),
            pl.BlockSpec(b2.shape, const),
            pl.BlockSpec(w3.shape, const),
            pl.BlockSpec(b3.shape, const),
        ],
        out_specs=pl.BlockSpec((3, tb), lambda i: (0, i)),   # lane-dense output
        compiler_params=pltpu.CompilerParams(
            dimension_semantics=("parallel",),          # 2 TCs on v7x
            vmem_limit_bytes=32 * 1024 * 1024,
        ),
        cost_estimate=pl.CostEstimate(
            flops=flops,
            transcendentals=3 * Bp,                     # 3 exps / column
            bytes_accessed=bytes_accessed,
        ),
    )(x, w1, b1, w2, b2, w3, b3)

    # Consumer expects the PyTorch layout (B, 3).
    return outT[:, :B].T


def init_params(key):
    """nn.Linear default init: uniform(+/- 1/sqrt(fan_in)); PyTorch (out,in) layout."""
    def linear(key, fan_in, fan_out):
        kw, kb = jax.random.split(key)
        bound = 1.0 / (float(fan_in) ** 0.5)
        w = jax.random.uniform(kw, (fan_out, fan_in), jnp.float32, -bound, bound)
        b = jax.random.uniform(kb, (fan_out, 1), jnp.float32, -bound, bound)
        return w, b

    k1, k2, k3 = jax.random.split(key, 3)
    w1, b1 = linear(k1, 19, 32)
    w2, b2 = linear(k2, 32, 16)
    w3, b3 = linear(k3, 16, 3)
    return {"w1": w1, "b1": b1, "w2": w2, "b2": b2, "w3": w3, "b3": b3}


def reference_forward(x, p):
    h1 = jax.nn.relu(x @ p["w1"].T + p["b1"].T)
    h2 = jax.nn.relu(h1 @ p["w2"].T + p["b2"].T)
    return jax.nn.softmax(h2 @ p["w3"].T + p["b3"].T, axis=-1)


if __name__ == "__main__":
    key = jax.random.PRNGKey(0)
    kx, kp = jax.random.split(key)

    B = 8
    x = jax.random.normal(kx, (B, 19), dtype=jnp.float32)
    params = init_params(kp)

    fwd = jax.jit(policy_network_forward)
    out = jax.block_until_ready(fwd(x, params))

    ref = reference_forward(x, params)
    assert out.shape == (B, 3)
    assert jnp.allclose(out, ref, atol=2e-3, rtol=2e-3), "mismatch vs reference"
    # Exact division in the softmax normalization -> rows sum to 1 in f32.
    assert jnp.allclose(jnp.sum(out, axis=-1), jnp.ones((B,)), atol=1e-5)

    print("KERNEL_OK")
</pallas_src>

<mosaic_0001>
module attributes {stable_mosaic.version = 11 : i64} {
  func.func @policy_mlp_kernel(%arg0: i32, %arg1: memref<128x19xf32, #tpu.memory_space<vmem>>, %arg2: memref<32x19xf32, #tpu.memory_space<vmem>>, %arg3: memref<32x1xf32, #tpu.memory_space<vmem>>, %arg4: memref<16x32xf32, #tpu.memory_space<vmem>>, %arg5: memref<16x1xf32, #tpu.memory_space<vmem>>, %arg6: memref<3x16xf32, #tpu.memory_space<vmem>>, %arg7: memref<3x1xf32, #tpu.memory_space<vmem>>, %arg8: memref<3x128xf32, #tpu.memory_space<vmem>>) attributes {dimension_semantics = [#tpu.dimension_semantics<parallel>], iteration_bounds = array<i64: 1>, scalar_prefetch = 0 : i64, scratch_operands = 0 : i64, tpu.core_type = #tpu.core_type<tc>, window_params = [{transform_indices = @transform_0, window_bounds = array<i64: 128, 19>}, {pipeline_mode = #tpu.pipeline_mode<synchronous>, transform_indices = @transform_1, window_bounds = array<i64: 32, 19>}, {pipeline_mode = #tpu.pipeline_mode<synchronous>, transform_indices = @transform_2, window_bounds = array<i64: 32, 1>}, {pipeline_mode = #tpu.pipeline_mode<synchronous>, transform_indices = @transform_3, window_bounds = array<i64: 16, 32>}, {pipeline_mode = #tpu.pipeline_mode<synchronous>, transform_indices = @transform_4, window_bounds = array<i64: 16, 1>}, {pipeline_mode = #tpu.pipeline_mode<synchronous>, transform_indices = @transform_5, window_bounds = array<i64: 3, 16>}, {pipeline_mode = #tpu.pipeline_mode<synchronous>, transform_indices = @transform_6, window_bounds = array<i64: 3, 1>}, {transform_indices = @transform_7, window_bounds = array<i64: 3, 128>}]} {
    %c0 = arith.constant 0 : index
    %c0_0 = arith.constant 0 : index
    %0 = vector.load %arg1[%c0, %c0_0] : memref<128x19xf32, #tpu.memory_space<vmem>>, vector<128x19xf32>
    %c0_1 = arith.constant 0 : index
    %c0_2 = arith.constant 0 : index
    %1 = vector.load %arg2[%c0_1, %c0_2] : memref<32x19xf32, #tpu.memory_space<vmem>>, vector<32x19xf32>
    %cst = arith.constant dense<0.000000e+00> : vector<32x128xf32>
    %2 = tpu.matmul %1, %0, %cst {dimension_numbers = #tpu.dot_dimension_numbers<[1], [1], [0], [0], [0, 0, 1, 0], [], []>} : vector<32x19xf32>, vector<128x19xf32>, vector<32x128xf32> -> vector<32x128xf32>
    %c0_3 = arith.constant 0 : index
    %c0_4 = arith.constant 0 : index
    %3 = vector.load %arg3[%c0_3, %c0_4] : memref<32x1xf32, #tpu.memory_space<vmem>>, vector<32x1xf32>
    %4 = vector.broadcast %3 : vector<32x1xf32> to vector<32x128xf32>
    %5 = arith.addf %2, %4 : vector<32x128xf32>
    %cst_5 = arith.constant 0.000000e+00 : f32
    %6 = vector.broadcast %cst_5 : f32 to vector<32x128xf32>
    %7 = arith.maximumf %5, %6 : vector<32x128xf32>
    %c0_6 = arith.constant 0 : index
    %c0_7 = arith.constant 0 : index
    %8 = vector.load %arg4[%c0_6, %c0_7] : memref<16x32xf32, #tpu.memory_space<vmem>>, vector<16x32xf32>
    %cst_8 = arith.constant dense<0.000000e+00> : vector<16x128xf32>
    %9 = tpu.matmul %8, %7, %cst_8 {dimension_numbers = #tpu.dot_dimension_numbers<[1], [0], [0], [1], [0, 0, 1, 1], [], []>} : vector<16x32xf32>, vector<32x128xf32>, vector<16x128xf32> -> vector<16x128xf32>
    %c0_9 = arith.constant 0 : index
    %c0_10 = arith.constant 0 : index
    %10 = vector.load %arg5[%c0_9, %c0_10] : memref<16x1xf32, #tpu.memory_space<vmem>>, vector<16x1xf32>
    %11 = vector.broadcast %10 : vector<16x1xf32> to vector<16x128xf32>
    %12 = arith.addf %9, %11 : vector<16x128xf32>
    %cst_11 = arith.constant 0.000000e+00 : f32
    %13 = vector.broadcast %cst_11 : f32 to vector<16x128xf32>
    %14 = arith.maximumf %12, %13 : vector<16x128xf32>
    %c0_12 = arith.constant 0 : index
    %c0_13 = arith.constant 0 : index
    %15 = vector.load %arg6[%c0_12, %c0_13] : memref<3x16xf32, #tpu.memory_space<vmem>>, vector<3x16xf32>
    %cst_14 = arith.constant dense<0.000000e+00> : vector<3x128xf32>
    %16 = tpu.matmul %15, %14, %cst_14 {dimension_numbers = #tpu.dot_dimension_numbers<[1], [0], [0], [1], [0, 0, 1, 1], [], []>} : vector<3x16xf32>, vector<16x128xf32>, vector<3x128xf32> -> vector<3x128xf32>
    %c0_15 = arith.constant 0 : index
    %c0_16 = arith.constant 0 : index
    %17 = vector.load %arg7[%c0_15, %c0_16] : memref<3x1xf32, #tpu.memory_space<vmem>>, vector<3x1xf32>
    %18 = vector.broadcast %17 : vector<3x1xf32> to vector<3x128xf32>
    %19 = arith.addf %16, %18 : vector<3x128xf32>
    %20 = vector.extract_strided_slice %19 {offsets = [0, 0], sizes = [1, 128], strides = [1, 1]} : vector<3x128xf32> to vector<1x128xf32>
    %21 = vector.extract_strided_slice %19 {offsets = [1, 0], sizes = [1, 128], strides = [1, 1]} : vector<3x128xf32> to vector<1x128xf32>
    %22 = vector.extract_strided_slice %19 {offsets = [2, 0], sizes = [1, 128], strides = [1, 1]} : vector<3x128xf32> to vector<1x128xf32>
    %23 = arith.maximumf %20, %21 : vector<1x128xf32>
    %24 = arith.maximumf %23, %22 : vector<1x128xf32>
    %25 = vector.broadcast %24 : vector<1x128xf32> to vector<3x128xf32>
    %26 = arith.subf %19, %25 : vector<3x128xf32>
    %27 = math.exp %26 : vector<3x128xf32>
    %28 = vector.extract_strided_slice %27 {offsets = [0, 0], sizes = [1, 128], strides = [1, 1]} : vector<3x128xf32> to vector<1x128xf32>
    %29 = vector.extract_strided_slice %27 {offsets = [1, 0], sizes = [1, 128], strides = [1, 1]} : vector<3x128xf32> to vector<1x128xf32>
    %30 = arith.addf %28, %29 : vector<1x128xf32>
    %31 = vector.extract_strided_slice %27 {offsets = [2, 0], sizes = [1, 128], strides = [1, 1]} : vector<3x128xf32> to vector<1x128xf32>
    %32 = arith.addf %30, %31 : vector<1x128xf32>
    %33 = vector.broadcast %32 : vector<1x128xf32> to vector<3x128xf32>
    %34 = arith.divf %27, %33 : vector<3x128xf32>
    %c0_17 = arith.constant 0 : index
    %c0_18 = arith.constant 0 : index
    %35 = vector.load %arg8[%c0_17, %c0_18] : memref<3x128xf32, #tpu.memory_space<vmem>>, vector<3x128xf32>
    tpu.vector_store %arg8[%c0_17, %c0_18], %34 {strides = array<i32>} : memref<3x128xf32, #tpu.memory_space<vmem>>, vector<3x128xf32>,
    return
  }
  func.func @transform_0(%arg0: i32) -> (i32, i32) {
    %c0_i32 = arith.constant 0 : i32
    %c0_i32_0 = arith.constant 0 : i32
    return %arg0, %c0_i32 : i32, i32
  }
  func.func @transform_1(%arg0: i32) -> (i32, i32) {
    %c0_i32 = arith.constant 0 : i32
    %c0_i32_0 = arith.constant 0 : i32
    %c0_i32_1 = arith.constant 0 : i32
    return %c0_i32, %c0_i32_0 : i32, i32
  }
  func.func @transform_2(%arg0: i32) -> (i32, i32) {
    %c0_i32 = arith.constant 0 : i32
    %c0_i32_0 = arith.constant 0 : i32
    %c0_i32_1 = arith.constant 0 : i32
    return %c0_i32, %c0_i32_0 : i32, i32
  }
  func.func @transform_3(%arg0: i32) -> (i32, i32) {
    %c0_i32 = arith.constant 0 : i32
    %c0_i32_0 = arith.constant 0 : i32
    %c0_i32_1 = arith.constant 0 : i32
    return %c0_i32, %c0_i32_0 : i32, i32
  }
  func.func @transform_4(%arg0: i32) -> (i32, i32) {
    %c0_i32 = arith.constant 0 : i32
    %c0_i32_0 = arith.constant 0 : i32
    %c0_i32_1 = arith.constant 0 : i32
    return %c0_i32, %c0_i32_0 : i32, i32
  }
  func.func @transform_5(%arg0: i32) -> (i32, i32) {
    %c0_i32 = arith.constant 0 : i32
    %c0_i32_0 = arith.constant 0 : i32
    %c0_i32_1 = arith.constant 0 : i32
    return %c0_i32, %c0_i32_0 : i32, i32
  }
  func.func @transform_6(%arg0: i32) -> (i32, i32) {
    %c0_i32 = arith.constant 0 : i32
    %c0_i32_0 = arith.constant 0 : i32
    %c0_i32_1 = arith.constant 0 : i32
    return %c0_i32, %c0_i32_0 : i32, i32
  }
  func.func @transform_7(%arg0: i32) -> (i32, i32) {
    %c0_i32 = arith.constant 0 : i32
    %c0_i32_0 = arith.constant 0 : i32
    return %c0_i32, %arg0 : i32, i32
  }
}

</mosaic_0001>

<bundles_post_ra>
// kernel: policy_network_forward.1
= control target key start
LH: loop header
LB: loop body
LE: loop exit
PB: predicated region body
PF: predicated region fallthrough
CT: control target
= control target key end

     0   :  { %vm70_vm0 = vcmask 154624   ;;  %v608_v3 = vmov 0   ;;  %vm234_vm2 = vcmask 261120   ;;  %v609_v57 = vmov 0.0|0.0   ;;  %s789_s0 = inlined_call_operand.vmem [shape: f32[128,19], index: 0, kind: input, shape index: {}]   ;;  %s790_s1 = inlined_call_operand.vmem [shape: f32[32,19], index: 1, kind: input, shape index: {}]   ;;  %s791_s2 = inlined_call_operand.vmem [shape: f32[32,1], index: 2, kind: input, shape index: {}]   ;;  %s792_s4 = inlined_call_operand.vmem [shape: f32[16,1], index: 4, kind: input, shape index: {}]   ;;  %s793_s6 = inlined_call_operand.vmem [shape: f32[3,1], index: 6, kind: input, shape index: {}]   ;;  %s794_s3 = inlined_call_operand.vmem [shape: f32[16,32], index: 3, kind: input, shape index: {}]   ;;  %s795_s5 = inlined_call_operand.vmem [shape: f32[3,16], index: 5, kind: input, shape index: {}]   ;;  %s796_s7 = inlined_call_operand.vmem [shape: f32[3,128], index: 7, kind: output, shape index: {}]  }
   0x1   :  { %v26_v0 = vld [vmem:[%s789_s0] sm:$0xff]  ;;  %v27_v1 = vld [vmem:[%s789_s0 + $0x8] sm:$0xff]  ;;  %vm660_vm1 = vmpackc.low %vm70_vm0, %vm70_vm0  ;;  %602 = vset.pattern.permute.xlu0 %v608_v3  ;;  %603 = vset.pattern.permute.xlu1 %v608_v3  ;;  %vm610_vm3 = vmmov 0   ;;  %v611_v58 = vmov 0.0   ;;  %vm325_vm4 = vcmask 130048  }
   0x2   :  { %v539_v4 = vpack.c.bf16 %v27_v1, %v26_v0  ;;  %v28_v5 = vld [vmem:[%s789_s0 + $0x10] sm:$0xff]  ;;  %v29_v6 = vld [vmem:[%s789_s0 + $0x18] sm:$0xff]  ;;  %v42_v8 = vld [vmem:[%s790_s1] sm:$0xff] }
   0x3   :  { %v545_v7 = vpack.c.bf16 %v29_v6, %v28_v5  ;;  %v30_v9 = vld [vmem:[%s789_s0 + $0x20] sm:$0xff]  ;;  %v31_v10 = vld [vmem:[%s789_s0 + $0x28] sm:$0xff]  ;;  %515 = vmatprep.mubr.msk.f32.mxu0 %vm70_vm0, %v42_v8  ;;  %v48_v12 = vld [vmem:[%s791_s2 + $0x10] sm:$0xff]  ;;  %v406_v5 = vlaneseq }
   0x4   :  { %541 = vmatprep.subr.msk.bf16.mxu0 %vm660_vm1, %v539_v4  ;;  %v46_v11 = vld [vmem:[%s791_s2] sm:$0xff]  ;;  %62 = vperm.xlu1 %603, %v48_v12   ;;  %v551_v13 = vpack.c.bf16 %v31_v10, %v30_v9  ;;  %v47_v14 = vld [vmem:[%s791_s2 + $0x8] sm:$0xff]  ;;  %v49_v15 = vld [vmem:[%s791_s2 + $0x18] sm:$0xff] }
   0x5   :  { %544 = vmatpush3.bf16.xpose.msk.msra.mxu0 %vm660_vm1, %v539_v4  ;;  %52 = vperm.xlu0 %602, %v46_v11   ;;  %v222_v16 = vld [vmem:[%s792_s4] sm:$0xff]  ;;  %v32_v17 = vld [vmem:[%s789_s0 + $0x30] sm:$0xff]  ;;  %v33_v18 = vld [vmem:[%s789_s0 + $0x38] sm:$0xff]  ;;  %v407_v9 = vshrl.u32 %v406_v5, 7 }
   0x6   :  { %547 = vmatprep.subr.msk.bf16.mxu0 %vm660_vm1, %v545_v7  ;;  %v223_v19 = vld [vmem:[%s792_s4 + $0x8] sm:$0xff]  ;;  %v557_v20 = vpack.c.bf16 %v33_v18, %v32_v17  ;;  %v319_v21 = vld [vmem:[%s793_s6] sm:$0x7]  ;;  %v36_v25 = vld [vmem:[%s789_s0 + $0x50] sm:$0xff] }
   0x7   :  { %v34_v22 = vld [vmem:[%s789_s0 + $0x40] sm:$0xff]  ;;  %v35_v23 = vld [vmem:[%s789_s0 + $0x48] sm:$0xff]  ;;  %v37_v26 = vld [vmem:[%s789_s0 + $0x58] sm:$0xff] }
   0x8   :  { %67 = vperm.xlu1 %603, %v49_v15   ;;  %v563_v24 = vpack.c.bf16 %v35_v23, %v34_v22  ;;  %v569_v27 = vpack.c.bf16 %v37_v26, %v36_v25  ;;  %v38_v28 = vld [vmem:[%s789_s0 + $0x60] sm:$0xff]  ;;  %v39_v29 = vld [vmem:[%s789_s0 + $0x68] sm:$0xff]  ;;  %v40_v31 = vld [vmem:[%s789_s0 + $0x70] sm:$0xff] }
   0x9   :  { %57 = vperm.xlu0 %602, %v47_v14   ;;  %v575_v30 = vpack.c.bf16 %v39_v29, %v38_v28  ;;  %v41_v32 = vld [vmem:[%s789_s0 + $0x78] sm:$0xff]  ;;  %v43_v34 = vld [vmem:[%s790_s1 + $0x8] sm:$0xff]  ;;  %v44_v35 = vld [vmem:[%s790_s1 + $0x10] sm:$0xff]  ;;  %v408_v14 = vsub.s32 0, %v407_v9 }
   0xa   :  { %v581_v33 = vpack.c.bf16 %v41_v32, %v40_v31  ;;  %v45_v36 = vld [vmem:[%s790_s1 + $0x18] sm:$0xff]  ;;  %v220_v37 = vld [vmem:[%s794_s3] sm:$0xff]  ;;  %v221_v56 = vld [vmem:[%s794_s3 + $0x8] sm:$0xff] }
   0xb   :  { %529 = vmatprep.mubr.msk.f32.mxu1 %vm234_vm2, %v220_v37  ;;  %v318_v4 = vld [vmem:[%s795_s5] sm:$0x7] }
   0xc   :  { %231 = vperm.xlu1 %603, %v223_v19  }
   0xd   :  { %550 = vmatpush3.bf16.xpose.msk.msra.mxu0 %vm660_vm1, %v545_v7  ;;  %226 = vperm.xlu0 %602, %v222_v16  }
   0xe   :  { %553 = vmatprep.subr.msk.bf16.mxu0 %vm660_vm1, %v551_v13 }
  0x11   :  { %322 = vperm.xlu0 %602, %v319_v21  }
  0x15   :  { %556 = vmatpush3.bf16.xpose.msk.msra.mxu0 %vm660_vm1, %v551_v13 }
  0x16   :  { %559 = vmatprep.subr.msk.bf16.mxu0 %vm660_vm1, %v557_v20 }
  0x1d   :  { %562 = vmatpush3.bf16.xpose.msk.msra.mxu0 %vm660_vm1, %v557_v20 }
  0x1e   :  { %565 = vmatprep.subr.msk.bf16.mxu0 %vm660_vm1, %v563_v24 }
  0x25   :  { %568 = vmatpush3.bf16.xpose.msk.msra.mxu0 %vm660_vm1, %v563_v24 }
  0x26   :  { %571 = vmatprep.subr.msk.bf16.mxu0 %vm660_vm1, %v569_v27 }
  0x2d   :  { %574 = vmatpush3.bf16.xpose.msk.msra.mxu0 %vm660_vm1, %v569_v27 }
  0x2e   :  { %577 = vmatprep.subr.msk.bf16.mxu0 %vm660_vm1, %v575_v30 }
  0x35   :  { %580 = vmatpush3.bf16.xpose.msk.msra.mxu0 %vm660_vm1, %v575_v30 }
  0x36   :  { %583 = vmatprep.subr.msk.bf16.mxu0 %vm660_vm1, %v581_v33 }
  0x3d   :  { %586 = vmatpush3.bf16.xpose.msk.msra.mxu0 %vm660_vm1, %v581_v33 }
  0x44   :  { %516 = vmatmul.mubr.msk.f32.vlgmr.msra.gmra.mrb[0].mxu0 %vm70_vm0, %v43_v34 }
  0x45   :  { %518 = vmatprep.mubr.msk.f32.mxu0 %vm70_vm0, %v44_v35 }
  0x48   :  { %519 = vmatmul.mubr.msk.f32.gmra.mrb[2].mxu0 %vm70_vm0, %v45_v36 }
  0x83   :  { %v63_v39 = vpop.permute.xlu1 %62 }
  0x84   :  { %v53_v38 = vpop.permute.xlu0 %52 }
  0x87   :  { %v68_v46 = vpop.permute.xlu1 %67 }
  0x88   :  { %v58_v40 = vpop.permute.xlu0 %57 }
  0x8b   :  { %v232_v59 = vpop.permute.xlu1 %231 }
  0x8c   :  { %v227_v61 = vpop.permute.xlu0 %226 }
  0x90   :  { %v323_v6 = vpop.permute.xlu0 %322 }
 0x117   :  { %v517_v41 = vpop.f32.mrb[0].mxu0 }
 0x118   :  { %v203_v42 = vadd.f32 %v517_v41, %v58_v40  ;;  %v197_v43 = vpop.f32.mrb[1].mxu0 }
 0x119   :  { %v198_v44 = vadd.f32 %v197_v43, %v53_v38 }
 0x11a   :  { %v217_v45 = vmax.f32 %v203_v42, 0.0 }
 0x11b   :  { %v216_v47 = vmax.f32 %v198_v44, 0.0  ;;  %v520_v48 = vpop.f32.mrb[2].mxu0 }
 0x11c   :  { %v213_v49 = vadd.f32 %v520_v48, %v68_v46  ;;  %v207_v50 = vpop.f32.mrb[3].mxu0 }
 0x11d   :  { %v208_v51 = vadd.f32 %v207_v50, %v63_v39  ;;  %v587_v52 = vpack.c.bf16 %v217_v45, %v216_v47 }
 0x11e   :  { %v219_v53 = vmax.f32 %v213_v49, 0.0 }
 0x11f   :  { %v218_v54 = vmax.f32 %v208_v51, 0.0  ;;  %588 = vmatprep.subr.bf16.mxu1 %v587_v52 }
 0x120   :  { %590 = vmatpush3.bf16.msra.mxu1 %v587_v52 }
 0x121   :  { %v591_v55 = vpack.c.bf16 %v219_v53, %v218_v54 }
 0x123   :  { %592 = vmatprep.subr.bf16.mxu1 %v591_v55 }
 0x124   :  { %594 = vmatpush3.bf16.msra.mxu1 %v591_v55 }
 0x125   :  { %595 = vmatprep.subr.bf16.mxu1 %v609_v57 }
 0x127   :  { %530 = vmatmul.mubr.msk.f32.vlgmr.msra.gmra.mrb[0].mxu1 %vm234_vm2, %v221_v56 }
 0x128   :  { %536 = vmatprep.mubr.msk.f32.mxu1 %vm610_vm3, %v611_v58 }
 0x1fa   :  { %v531_v60 = vpop.f32.mrb[0].mxu1 }
 0x1fb   :  { %v313_v62 = vadd.f32 %v531_v60, %v232_v59  ;;  %v307_v63 = vpop.f32.mrb[1].mxu1 }
 0x1fc   :  { %v308_v0 = vadd.f32 %v307_v63, %v227_v61 }
 0x1fd   :  { %v317_v1 = vmax.f32 %v313_v62, 0.0 }
 0x1fe   :  { %v316_v2 = vmax.f32 %v308_v0, 0.0 }
 0x200   :  { %v596_v3 = vpack.c.bf16 %v317_v1, %v316_v2 }
 0x202   :  { %597 = vmatpush3.bf16.msra.mxu1 %v596_v3 }
 0x205   :  { %537 = vmatmul.mubr.msk.f32.vlgmr.msra.gmra.mrb[2].mxu1 %vm325_vm4, %v318_v4 }
 0x2d8   :  { %v395_v7 = vpop.f32.mrb[2].mxu1 }
 0x2d9   :  { %v396_v8 = vadd.f32 %v395_v7, %v323_v6  ;;  %v538_v10 = vpop.f32.mrb[3].mxu1 }
 0x2db   :  { %v400_v11 = vrot.slane %v396_v8, 1  ;;  %v403_v13 = vrot.slane %v396_v8, 2 }
 0x2dd   :  { %v402_v12 = vmax.f32 %v396_v8, %v400_v11 }
 0x2df   :  { %v405_v15 = vmax.f32 %v402_v12, %v403_v13 }
 0x2e1   :  { %v409_v16 = vrot.slane %v405_v15, %v408_v14 }
 0x2e3   :  { %v410_v17 = vsub.f32 %v396_v8, %v409_v16 }
 0x2e5   :  { %v411_v18 = vmul.f32 1.442695, %v410_v17 }
 0x2e7   :  { %604 = vpow2.f32 %v411_v18 }
 0x2f1   :  { %v605_v19 = vpop.eup %604 }
 0x2f2   :  { %v414_v20 = vrot.slane %v605_v19, 1  ;;  %v417_v22 = vrot.slane %v605_v19, 2 }
 0x2f4   :  { %v416_v21 = vadd.f32 %v605_v19, %v414_v20 }
 0x2f6   :  { %v419_v23 = vadd.f32 %v417_v22, %v416_v21 }
 0x2f8   :  { %v423_v24 = vrot.slane %v419_v23, %v408_v14 }
 0x2fa   :  { %606 = vrcp.f32 %v423_v24 }
 0x304   :  { %v607_v25 = vpop.eup %606 }
 0x305   :  { %v425_v26 = vmul.f32 %v607_v25, %v605_v19 }
 0x307   :  { %426 = vst [vmem:[%s796_s7] sm:$0x7] %v425_v26 }

</bundles_post_ra>
